<compile_context>
chip_gen: v5e
topology: v5e:2x2
jax: 0.10.0
libtpu: 0.0.40
codegen_flags: <defaults>
</compile_context>

<pallas_src>
import functools

import jax
import jax.numpy as jnp
from jax.experimental import pallas as pl
from jax.experimental.pallas import tpu as pltpu


def _conv_kernel(x_ref, w_ref, b_ref, o_ref, patch_ref, *,
                 H, W, KH, KW, PH, PW, IC):
    """Implicit-GEMM conv for one batch element.

    x_ref:     (1, IC, H*W)        activations, spatial flattened onto lanes
    w_ref:     (OC, KH*KW*IC)      mixed ISO weight, column index = m*IC + i
    b_ref:     (OC, 1)             bias (f32)
    o_ref:     (1, OC, H*W)        output, lane-dense spatial
    patch_ref: (KH*KW*IC, H*W)     VMEM scratch: stacked shifted taps
    """
    HW = H * W
    x_flat = x_ref[0]                          # (IC, H*W)
    dt = x_flat.dtype

    # Column-validity masks (zero padding along W); only KW distinct masks.
    ow = jax.lax.broadcasted_iota(jnp.int32, (1, HW), 1) % W
    col_masks = [((ow + (kw - PW)) >= 0) & ((ow + (kw - PW)) < W)
                 for kw in range(KW)]

    # Stack the KH*KW taps: row block m*IC..(m+1)*IC holds the input shifted
    # by tap m = (kh, kw).  Row (H) padding is handled by the zero fill of the
    # lane shift; column (W) padding by the mask.  Static lane shifts only --
    # no per-tap reshape relayouts.
    for kh in range(KH):
        for kw in range(KW):
            m = kh * KW + kw
            off = (kh - PH) * W + (kw - PW)
            if off > 0:
                shifted = jnp.concatenate(
                    [x_flat[:, off:], jnp.zeros((IC, off), dt)], axis=1)
            elif off < 0:
                shifted = jnp.concatenate(
                    [jnp.zeros((IC, -off), dt), x_flat[:, :HW + off]], axis=1)
            else:
                shifted = x_flat
            patch_ref[m * IC:(m + 1) * IC, :] = jnp.where(
                col_masks[kw], shifted, 0)

    # One fused matmul: (OC, KH*KW*IC) @ (KH*KW*IC, H*W) -> (OC, H*W), f32 acc.
    acc = jnp.dot(w_ref[...], patch_ref[...],
                  preferred_element_type=jnp.float32)
    o_ref[0] = (acc + b_ref[...]).astype(o_ref.dtype)


def iso_conv2d_forward(x_nchw, g_l, f_l, bias, *, kernel_size, padding):
    """ISOConv2d.forward for groups=1, stride=1, dilation=1, zeros padding."""
    KH, KW = kernel_size
    HL = KH * KW
    OC = g_l.shape[0]
    IC = f_l.shape[0]
    assert g_l.shape == (OC, IC, HL), "groups != 1 not implemented"
    B, _, H, W = x_nchw.shape
    PH, PW = padding
    OH = H + 2 * PH - KH + 1
    OW = W + 2 * PW - KW + 1
    assert OH <= H and OW <= W, "padding > (k-1)//2 not implemented"

    HW = H * W
    dtype = x_nchw.dtype

    # ---- ISO weight mixing (tiny; one fused einsum, no extra kernel) ------
    # D = F_l + I ;  W[o, m, i] = sum_s D[i, m, s] * G_l[o, i, s]
    d = f_l + jnp.eye(HL, dtype=f_l.dtype)[None, :, :]
    w_omi = jnp.einsum('ims,ois->omi', d, g_l)               # (OC, HL, IC)
    w2 = w_omi.reshape(OC, HL * IC).astype(dtype)            # col idx = m*IC+i
    bias2d = bias.reshape(OC, 1).astype(jnp.float32)

    # ---- convolution: flatten spatial onto lanes, keep NCHW ----------------
    x_flat = x_nchw.reshape(B, IC, HW)                       # free reshape

    kernel = functools.partial(_conv_kernel, H=H, W=W, KH=KH, KW=KW,
                               PH=PH, PW=PW, IC=IC)

    flops = 2 * B * OH * OW * IC * OC * KH * KW
    bytes_accessed = (x_flat.size * x_flat.dtype.itemsize
                      + w2.size * w2.dtype.itemsize
                      + bias2d.size * bias2d.dtype.itemsize
                      + B * OC * HW * jnp.dtype(dtype).itemsize)

    out_flat = pl.pallas_call(
        kernel,
        out_shape=jax.ShapeDtypeStruct((B, OC, HW), dtype),
        grid=(B,),
        in_specs=[
            pl.BlockSpec((1, IC, HW), lambda b: (b, 0, 0)),
            pl.BlockSpec((OC, HL * IC), lambda b: (0, 0)),
            pl.BlockSpec((OC, 1), lambda b: (0, 0)),
        ],
        out_specs=pl.BlockSpec((1, OC, HW), lambda b: (b, 0, 0)),
        scratch_shapes=[pltpu.VMEM((HL * IC, HW), dtype)],
        compiler_params=pltpu.CompilerParams(
            dimension_semantics=("parallel",),
            vmem_limit_bytes=32 * 1024 * 1024),
        cost_estimate=pl.CostEstimate(flops=flops, transcendentals=0,
                                      bytes_accessed=bytes_accessed),
    )(x_flat, w2, bias2d)

    out = out_flat.reshape(B, OC, H, W)                       # NCHW, free
    if (OH, OW) != (H, W):
        out = out[:, :, :OH, :OW]
    return out


if __name__ == "__main__":
    # Small shapes consistent with the module: ISOConv2d(4, 8, kernel_size=3, padding=1)
    B, IC, OC, H, W = 2, 4, 8, 16, 16
    K = 3
    HL = K * K
    PAD = 1

    key = jax.random.PRNGKey(0)
    kx, kg, kf, kb = jax.random.split(key, 4)

    x = jax.random.normal(kx, (B, IC, H, W), dtype=jnp.float32)

    # G_l: kaiming_uniform_(a=sqrt(5)) -> uniform(-1/sqrt(fan_in), 1/sqrt(fan_in))
    fan_in = IC * HL
    bound = 1.0 / (fan_in ** 0.5)
    g_l = jax.random.uniform(kg, (OC, IC, HL), jnp.float32, -bound, bound)
    # F_l is zero-initialized in the torch module; use small random values here
    # so the weight-mixing path is actually exercised by the check.
    f_l = 0.1 * jax.random.normal(kf, (IC, HL, HL), dtype=jnp.float32)
    bias = jax.random.uniform(kb, (OC,), jnp.float32, -bound, bound)

    fwd = jax.jit(functools.partial(iso_conv2d_forward,
                                    kernel_size=(K, K), padding=(PAD, PAD)))
    out = jax.block_until_ready(fwd(x, g_l, f_l, bias))
    assert out.shape == (B, OC, H, W)

    # Pure-JAX reference of the torch forward (einsum + conv2d + bias).
    d_ref = f_l + jnp.eye(HL, dtype=jnp.float32)[None, :, :]
    iso_w = jnp.einsum('ims,ois->oim', d_ref, g_l).reshape(OC, IC, K, K)
    ref = jax.lax.conv_general_dilated(
        x, iso_w, window_strides=(1, 1), padding=((PAD, PAD), (PAD, PAD)),
        dimension_numbers=('NCHW', 'OIHW', 'NCHW')) + bias[None, :, None, None]

    assert jnp.allclose(out, ref, atol=1e-4, rtol=1e-4), "mismatch vs reference"
    print("KERNEL_OK")
</pallas_src>

<mosaic_0001>
module attributes {stable_mosaic.version = 11 : i64} {
  func.func @_conv_kernel(%arg0: i32, %arg1: memref<1x4x256xf32, #tpu.memory_space<vmem>>, %arg2: memref<8x36xf32, #tpu.memory_space<vmem>>, %arg3: memref<8x1xf32, #tpu.memory_space<vmem>>, %arg4: memref<1x8x256xf32, #tpu.memory_space<vmem>>, %arg5: memref<36x256xf32, #tpu.memory_space<vmem>>) attributes {dimension_semantics = [#tpu.dimension_semantics<parallel>], iteration_bounds = array<i64: 2>, scalar_prefetch = 0 : i64, scratch_operands = 1 : i64, tpu.core_type = #tpu.core_type<tc>, window_params = [{transform_indices = @transform_0, window_bounds = array<i64: 1, 4, 256>}, {pipeline_mode = #tpu.pipeline_mode<synchronous>, transform_indices = @transform_1, window_bounds = array<i64: 8, 36>}, {pipeline_mode = #tpu.pipeline_mode<synchronous>, transform_indices = @transform_2, window_bounds = array<i64: 8, 1>}, {transform_indices = @transform_3, window_bounds = array<i64: 1, 8, 256>}]} {
    %c0 = arith.constant 0 : index
    %c0_0 = arith.constant 0 : index
    %c0_1 = arith.constant 0 : index
    %0 = vector.load %arg1[%c0, %c0_0, %c0_1] : memref<1x4x256xf32, #tpu.memory_space<vmem>>, vector<1x4x256xf32>
    %1 = vector.shape_cast %0 : vector<1x4x256xf32> to vector<4x256xf32>
    %2 = tpu.iota {dimensions = array<i32: 1>} : vector<1x256xi32>
    %c16_i32 = arith.constant 16 : i32
    %c0_i32 = arith.constant 0 : i32
    %3 = arith.cmpi eq, %c16_i32, %c0_i32 : i32
    %c1_i32 = arith.constant 1 : i32
    %4 = arith.select %3, %c1_i32, %c16_i32 : i32
    %5 = vector.broadcast %4 : i32 to vector<1x256xi32>
    %6 = arith.remsi %2, %5 : vector<1x256xi32>
    %c0_i32_2 = arith.constant 0 : i32
    %7 = vector.broadcast %c0_i32_2 : i32 to vector<1x256xi32>
    %8 = arith.cmpi ne, %6, %7 : vector<1x256xi32>
    %c0_i32_3 = arith.constant 0 : i32
    %9 = vector.broadcast %c0_i32_3 : i32 to vector<1x256xi32>
    %10 = arith.cmpi slt, %6, %9 : vector<1x256xi32>
    %c0_i32_4 = arith.constant 0 : i32
    %11 = arith.cmpi slt, %4, %c0_i32_4 : i32
    %12 = vector.broadcast %11 : i1 to vector<1x256xi1>
    %13 = vector.broadcast %12 : vector<1x256xi1> to vector<1x256xi1>
    %14 = arith.xori %10, %13 : vector<1x256xi1>
    %15 = arith.andi %14, %8 : vector<1x256xi1>
    %16 = vector.broadcast %4 : i32 to vector<1x256xi32>
    %17 = arith.addi %6, %16 : vector<1x256xi32>
    %18 = arith.select %15, %17, %6 : vector<1x256xi1>, vector<1x256xi32>
    %c-1_i32 = arith.constant -1 : i32
    %19 = vector.broadcast %c-1_i32 : i32 to vector<1x256xi32>
    %20 = arith.addi %18, %19 : vector<1x256xi32>
    %c0_i32_5 = arith.constant 0 : i32
    %21 = vector.broadcast %c0_i32_5 : i32 to vector<1x256xi32>
    %22 = arith.cmpi sge, %20, %21 : vector<1x256xi32>
    %c-1_i32_6 = arith.constant -1 : i32
    %23 = vector.broadcast %c-1_i32_6 : i32 to vector<1x256xi32>
    %24 = arith.addi %18, %23 : vector<1x256xi32>
    %c16_i32_7 = arith.constant 16 : i32
    %25 = vector.broadcast %c16_i32_7 : i32 to vector<1x256xi32>
    %26 = arith.cmpi slt, %24, %25 : vector<1x256xi32>
    %27 = arith.andi %22, %26 : vector<1x256xi1>
    %c0_i32_8 = arith.constant 0 : i32
    %28 = vector.broadcast %c0_i32_8 : i32 to vector<1x256xi32>
    %29 = arith.addi %18, %28 : vector<1x256xi32>
    %c0_i32_9 = arith.constant 0 : i32
    %30 = vector.broadcast %c0_i32_9 : i32 to vector<1x256xi32>
    %31 = arith.cmpi sge, %29, %30 : vector<1x256xi32>
    %c0_i32_10 = arith.constant 0 : i32
    %32 = vector.broadcast %c0_i32_10 : i32 to vector<1x256xi32>
    %33 = arith.addi %18, %32 : vector<1x256xi32>
    %c16_i32_11 = arith.constant 16 : i32
    %34 = vector.broadcast %c16_i32_11 : i32 to vector<1x256xi32>
    %35 = arith.cmpi slt, %33, %34 : vector<1x256xi32>
    %36 = arith.andi %31, %35 : vector<1x256xi1>
    %c1_i32_12 = arith.constant 1 : i32
    %37 = vector.broadcast %c1_i32_12 : i32 to vector<1x256xi32>
    %38 = arith.addi %18, %37 : vector<1x256xi32>
    %c0_i32_13 = arith.constant 0 : i32
    %39 = vector.broadcast %c0_i32_13 : i32 to vector<1x256xi32>
    %40 = arith.cmpi sge, %38, %39 : vector<1x256xi32>
    %c1_i32_14 = arith.constant 1 : i32
    %41 = vector.broadcast %c1_i32_14 : i32 to vector<1x256xi32>
    %42 = arith.addi %18, %41 : vector<1x256xi32>
    %c16_i32_15 = arith.constant 16 : i32
    %43 = vector.broadcast %c16_i32_15 : i32 to vector<1x256xi32>
    %44 = arith.cmpi slt, %42, %43 : vector<1x256xi32>
    %45 = arith.andi %40, %44 : vector<1x256xi1>
    %cst = arith.constant 0.000000e+00 : f32
    %46 = vector.broadcast %cst : f32 to vector<4x17xf32>
    %47 = vector.extract_strided_slice %1 {offsets = [0, 0], sizes = [4, 239], strides = [1, 1]} : vector<4x256xf32> to vector<4x239xf32>
    %48 = tpu.concatenate %46, %47 in 1 : vector<4x17xf32>, vector<4x239xf32> -> vector<4x256xf32>
    %c0_i32_16 = arith.constant 0 : i32
    %49 = arith.sitofp %c0_i32_16 : i32 to f32
    %50 = vector.shape_cast %27 : vector<1x256xi1> to vector<1x256xi1>
    %51 = vector.broadcast %50 : vector<1x256xi1> to vector<4x256xi1>
    %52 = vector.broadcast %49 : f32 to vector<4x256xf32>
    %53 = arith.select %51, %48, %52 : vector<4x256xi1>, vector<4x256xf32>
    %c0_17 = arith.constant 0 : index
    %c0_18 = arith.constant 0 : index
    %54 = vector.load %arg5[%c0_17, %c0_18] : memref<36x256xf32, #tpu.memory_space<vmem>>, vector<4x256xf32>
    tpu.vector_store %arg5[%c0_17, %c0_18], %53 {strides = array<i32>} : memref<36x256xf32, #tpu.memory_space<vmem>>, vector<4x256xf32>,
    %cst_19 = arith.constant 0.000000e+00 : f32
    %55 = vector.broadcast %cst_19 : f32 to vector<4x16xf32>
    %56 = vector.extract_strided_slice %1 {offsets = [0, 0], sizes = [4, 240], strides = [1, 1]} : vector<4x256xf32> to vector<4x240xf32>
    %57 = tpu.concatenate %55, %56 in 1 : vector<4x16xf32>, vector<4x240xf32> -> vector<4x256xf32>
    %c0_i32_20 = arith.constant 0 : i32
    %58 = arith.sitofp %c0_i32_20 : i32 to f32
    %59 = vector.shape_cast %36 : vector<1x256xi1> to vector<1x256xi1>
    %60 = vector.broadcast %59 : vector<1x256xi1> to vector<4x256xi1>
    %61 = vector.broadcast %58 : f32 to vector<4x256xf32>
    %62 = arith.select %60, %57, %61 : vector<4x256xi1>, vector<4x256xf32>
    %c4 = arith.constant 4 : index
    %c0_21 = arith.constant 0 : index
    %63 = vector.load %arg5[%c4, %c0_21] : memref<36x256xf32, #tpu.memory_space<vmem>>, vector<4x256xf32>
    tpu.vector_store %arg5[%c4, %c0_21], %62 {strides = array<i32>} : memref<36x256xf32, #tpu.memory_space<vmem>>, vector<4x256xf32>,
    %cst_22 = arith.constant 0.000000e+00 : f32
    %64 = vector.broadcast %cst_22 : f32 to vector<4x15xf32>
    %65 = vector.extract_strided_slice %1 {offsets = [0, 0], sizes = [4, 241], strides = [1, 1]} : vector<4x256xf32> to vector<4x241xf32>
    %66 = tpu.concatenate %64, %65 in 1 : vector<4x15xf32>, vector<4x241xf32> -> vector<4x256xf32>
    %c0_i32_23 = arith.constant 0 : i32
    %67 = arith.sitofp %c0_i32_23 : i32 to f32
    %68 = vector.shape_cast %45 : vector<1x256xi1> to vector<1x256xi1>
    %69 = vector.broadcast %68 : vector<1x256xi1> to vector<4x256xi1>
    %70 = vector.broadcast %67 : f32 to vector<4x256xf32>
    %71 = arith.select %69, %66, %70 : vector<4x256xi1>, vector<4x256xf32>
    %c8 = arith.constant 8 : index
    %c0_24 = arith.constant 0 : index
    %72 = vector.load %arg5[%c8, %c0_24] : memref<36x256xf32, #tpu.memory_space<vmem>>, vector<4x256xf32>
    tpu.vector_store %arg5[%c8, %c0_24], %71 {strides = array<i32>} : memref<36x256xf32, #tpu.memory_space<vmem>>, vector<4x256xf32>,
    %cst_25 = arith.constant 0.000000e+00 : f32
    %73 = vector.broadcast %cst_25 : f32 to vector<4x1xf32>
    %74 = vector.extract_strided_slice %1 {offsets = [0, 0], sizes = [4, 255], strides = [1, 1]} : vector<4x256xf32> to vector<4x255xf32>
    %75 = tpu.concatenate %73, %74 in 1 : vector<4x1xf32>, vector<4x255xf32> -> vector<4x256xf32>
    %c0_i32_26 = arith.constant 0 : i32
    %76 = arith.sitofp %c0_i32_26 : i32 to f32
    %77 = vector.shape_cast %27 : vector<1x256xi1> to vector<1x256xi1>
    %78 = vector.broadcast %77 : vector<1x256xi1> to vector<4x256xi1>
    %79 = vector.broadcast %76 : f32 to vector<4x256xf32>
    %80 = arith.select %78, %75, %79 : vector<4x256xi1>, vector<4x256xf32>
    %c12 = arith.constant 12 : index
    %c0_27 = arith.constant 0 : index
    %81 = vector.load %arg5[%c12, %c0_27] : memref<36x256xf32, #tpu.memory_space<vmem>>, vector<4x256xf32>
    tpu.vector_store %arg5[%c12, %c0_27], %80 {strides = array<i32>} : memref<36x256xf32, #tpu.memory_space<vmem>>, vector<4x256xf32>,
    %c0_i32_28 = arith.constant 0 : i32
    %82 = arith.sitofp %c0_i32_28 : i32 to f32
    %83 = vector.shape_cast %36 : vector<1x256xi1> to vector<1x256xi1>
    %84 = vector.broadcast %83 : vector<1x256xi1> to vector<4x256xi1>
    %85 = vector.broadcast %82 : f32 to vector<4x256xf32>
    %86 = arith.select %84, %1, %85 : vector<4x256xi1>, vector<4x256xf32>
    %c16 = arith.constant 16 : index
    %c0_29 = arith.constant 0 : index
    %87 = vector.load %arg5[%c16, %c0_29] : memref<36x256xf32, #tpu.memory_space<vmem>>, vector<4x256xf32>
    tpu.vector_store %arg5[%c16, %c0_29], %86 {strides = array<i32>} : memref<36x256xf32, #tpu.memory_space<vmem>>, vector<4x256xf32>,
    %88 = vector.extract_strided_slice %1 {offsets = [0, 1], sizes = [4, 255], strides = [1, 1]} : vector<4x256xf32> to vector<4x255xf32>
    %cst_30 = arith.constant 0.000000e+00 : f32
    %89 = vector.broadcast %cst_30 : f32 to vector<4x1xf32>
    %90 = tpu.concatenate %88, %89 in 1 : vector<4x255xf32>, vector<4x1xf32> -> vector<4x256xf32>
    %c0_i32_31 = arith.constant 0 : i32
    %91 = arith.sitofp %c0_i32_31 : i32 to f32
    %92 = vector.shape_cast %45 : vector<1x256xi1> to vector<1x256xi1>
    %93 = vector.broadcast %92 : vector<1x256xi1> to vector<4x256xi1>
    %94 = vector.broadcast %91 : f32 to vector<4x256xf32>
    %95 = arith.select %93, %90, %94 : vector<4x256xi1>, vector<4x256xf32>
    %c20 = arith.constant 20 : index
    %c0_32 = arith.constant 0 : index
    %96 = vector.load %arg5[%c20, %c0_32] : memref<36x256xf32, #tpu.memory_space<vmem>>, vector<4x256xf32>
    tpu.vector_store %arg5[%c20, %c0_32], %95 {strides = array<i32>} : memref<36x256xf32, #tpu.memory_space<vmem>>, vector<4x256xf32>,
    %97 = vector.extract_strided_slice %1 {offsets = [0, 15], sizes = [4, 241], strides = [1, 1]} : vector<4x256xf32> to vector<4x241xf32>
    %cst_33 = arith.constant 0.000000e+00 : f32
    %98 = vector.broadcast %cst_33 : f32 to vector<4x15xf32>
    %99 = tpu.concatenate %97, %98 in 1 : vector<4x241xf32>, vector<4x15xf32> -> vector<4x256xf32>
    %c0_i32_34 = arith.constant 0 : i32
    %100 = arith.sitofp %c0_i32_34 : i32 to f32
    %101 = vector.shape_cast %27 : vector<1x256xi1> to vector<1x256xi1>
    %102 = vector.broadcast %101 : vector<1x256xi1> to vector<4x256xi1>
    %103 = vector.broadcast %100 : f32 to vector<4x256xf32>
    %104 = arith.select %102, %99, %103 : vector<4x256xi1>, vector<4x256xf32>
    %c24 = arith.constant 24 : index
    %c0_35 = arith.constant 0 : index
    %105 = vector.load %arg5[%c24, %c0_35] : memref<36x256xf32, #tpu.memory_space<vmem>>, vector<4x256xf32>
    tpu.vector_store %arg5[%c24, %c0_35], %104 {strides = array<i32>} : memref<36x256xf32, #tpu.memory_space<vmem>>, vector<4x256xf32>,
    %106 = vector.extract_strided_slice %1 {offsets = [0, 16], sizes = [4, 240], strides = [1, 1]} : vector<4x256xf32> to vector<4x240xf32>
    %cst_36 = arith.constant 0.000000e+00 : f32
    %107 = vector.broadcast %cst_36 : f32 to vector<4x16xf32>
    %108 = tpu.concatenate %106, %107 in 1 : vector<4x240xf32>, vector<4x16xf32> -> vector<4x256xf32>
    %c0_i32_37 = arith.constant 0 : i32
    %109 = arith.sitofp %c0_i32_37 : i32 to f32
    %110 = vector.shape_cast %36 : vector<1x256xi1> to vector<1x256xi1>
    %111 = vector.broadcast %110 : vector<1x256xi1> to vector<4x256xi1>
    %112 = vector.broadcast %109 : f32 to vector<4x256xf32>
    %113 = arith.select %111, %108, %112 : vector<4x256xi1>, vector<4x256xf32>
    %c28 = arith.constant 28 : index
    %c0_38 = arith.constant 0 : index
    %114 = vector.load %arg5[%c28, %c0_38] : memref<36x256xf32, #tpu.memory_space<vmem>>, vector<4x256xf32>
    tpu.vector_store %arg5[%c28, %c0_38], %113 {strides = array<i32>} : memref<36x256xf32, #tpu.memory_space<vmem>>, vector<4x256xf32>,
    %115 = vector.extract_strided_slice %1 {offsets = [0, 17], sizes = [4, 239], strides = [1, 1]} : vector<4x256xf32> to vector<4x239xf32>
    %cst_39 = arith.constant 0.000000e+00 : f32
    %116 = vector.broadcast %cst_39 : f32 to vector<4x17xf32>
    %117 = tpu.concatenate %115, %116 in 1 : vector<4x239xf32>, vector<4x17xf32> -> vector<4x256xf32>
    %c0_i32_40 = arith.constant 0 : i32
    %118 = arith.sitofp %c0_i32_40 : i32 to f32
    %119 = vector.shape_cast %45 : vector<1x256xi1> to vector<1x256xi1>
    %120 = vector.broadcast %119 : vector<1x256xi1> to vector<4x256xi1>
    %121 = vector.broadcast %118 : f32 to vector<4x256xf32>
    %122 = arith.select %120, %117, %121 : vector<4x256xi1>, vector<4x256xf32>
    %c32 = arith.constant 32 : index
    %c0_41 = arith.constant 0 : index
    %123 = vector.load %arg5[%c32, %c0_41] : memref<36x256xf32, #tpu.memory_space<vmem>>, vector<4x256xf32>
    tpu.vector_store %arg5[%c32, %c0_41], %122 {strides = array<i32>} : memref<36x256xf32, #tpu.memory_space<vmem>>, vector<4x256xf32>,
    %c0_42 = arith.constant 0 : index
    %c0_43 = arith.constant 0 : index
    %124 = vector.load %arg2[%c0_42, %c0_43] : memref<8x36xf32, #tpu.memory_space<vmem>>, vector<8x36xf32>
    %c0_44 = arith.constant 0 : index
    %c0_45 = arith.constant 0 : index
    %125 = vector.load %arg5[%c0_44, %c0_45] : memref<36x256xf32, #tpu.memory_space<vmem>>, vector<36x256xf32>
    %cst_46 = arith.constant dense<0.000000e+00> : vector<8x256xf32>
    %126 = tpu.matmul %124, %125, %cst_46 {dimension_numbers = #tpu.dot_dimension_numbers<[1], [0], [0], [1], [0, 0, 1, 1], [], []>} : vector<8x36xf32>, vector<36x256xf32>, vector<8x256xf32> -> vector<8x256xf32>
    %c0_47 = arith.constant 0 : index
    %c0_48 = arith.constant 0 : index
    %127 = vector.load %arg3[%c0_47, %c0_48] : memref<8x1xf32, #tpu.memory_space<vmem>>, vector<8x1xf32>
    %128 = vector.broadcast %127 : vector<8x1xf32> to vector<8x256xf32>
    %129 = arith.addf %126, %128 : vector<8x256xf32>
    %c0_49 = arith.constant 0 : index
    %c0_50 = arith.constant 0 : index
    %c0_51 = arith.constant 0 : index
    %130 = vector.load %arg4[%c0_49, %c0_50, %c0_51] : memref<1x8x256xf32, #tpu.memory_space<vmem>>, vector<1x8x256xf32>
    %131 = vector.shape_cast %130 : vector<1x8x256xf32> to vector<8x256xf32>
    %132 = vector.shape_cast %129 : vector<8x256xf32> to vector<1x8x256xf32>
    tpu.vector_store %arg4[%c0_49, %c0_50, %c0_51], %132 {strides = array<i32>} : memref<1x8x256xf32, #tpu.memory_space<vmem>>, vector<1x8x256xf32>,
    return
  }
  func.func @transform_0(%arg0: i32) -> (i32, i32, i32) {
    %c0_i32 = arith.constant 0 : i32
    %c0_i32_0 = arith.constant 0 : i32
    %c0_i32_1 = arith.constant 0 : i32
    return %arg0, %c0_i32, %c0_i32_0 : i32, i32, i32
  }
  func.func @transform_1(%arg0: i32) -> (i32, i32) {
    %c0_i32 = arith.constant 0 : i32
    %c0_i32_0 = arith.constant 0 : i32
    %c0_i32_1 = arith.constant 0 : i32
    return %c0_i32, %c0_i32_0 : i32, i32
  }
  func.func @transform_2(%arg0: i32) -> (i32, i32) {
    %c0_i32 = arith.constant 0 : i32
    %c0_i32_0 = arith.constant 0 : i32
    %c0_i32_1 = arith.constant 0 : i32
    return %c0_i32, %c0_i32_0 : i32, i32
  }
  func.func @transform_3(%arg0: i32) -> (i32, i32, i32) {
    %c0_i32 = arith.constant 0 : i32
    %c0_i32_0 = arith.constant 0 : i32
    %c0_i32_1 = arith.constant 0 : i32
    return %arg0, %c0_i32, %c0_i32_0 : i32, i32, i32
  }
}

</mosaic_0001>

<bundles_post_ra>
// kernel: iso_conv2d_forward.1
= control target key start
LH: loop header
LB: loop body
LE: loop exit
PB: predicated region body
PF: predicated region fallthrough
CT: control target
= control target key end

     0   :  { %s593_s12 = smov 0   ;;  %s662_s0 = inlined_call_operand.vmem [shape: f32[2,4,256], index: 0, kind: input, shape index: {}]   ;;  %s663_s1 = inlined_call_operand.vmem [shape: f32[8,36], index: 1, kind: input, shape index: {}]   ;;  %s664_s2 = inlined_call_operand.vmem [shape: f32[8,1], index: 2, kind: input, shape index: {}]   ;;  %s665_s3 = inlined_call_operand.vmem [shape: f32[2,8,256], index: 3, kind: output, shape index: {}]  }
   0x1 LB: > { %s520_s13 = sadd.s32 4294967295, %s562_s12   ;;  %p524_p0 = scmp.ge.s32.totalorder %s562_s12, 1  ;;  %s562_s12 = sphi %s593_s12, %s13_s12  }
   0x2   : > { %p137_p1 = scmp.lt.s32.totalorder %s562_s12, 3 }
   0x4   : > { %p138_p2 = pnand %p524_p0, %p137_p1 }
   0x5   : > { %p161_p3 = scmp.lt.s32.totalorder (!%p138_p2), %s520_s13, 1  ;;  %s564_s18 = smov (!%p138_p2), 16  }
   0x6   : > { %141 = sbr.rel (%p138_p2) target bundleno = 360 (0x168), region = 32  ;;  %s565_s19 = smov (!%p138_p2), 15  }
   0x7   : > { %s566_s20 = smov (!%p138_p2), 1   ;;  %s567_s21 = smov (!%p138_p2), 127  }
   0x8   : > { %s568_s22 = smov (!%p138_p2), 113   ;;  %s569_s23 = smov (!%p138_p2), 112  }
   0x9   : > { %s570_s24 = smov (!%p138_p2), 17   ;;  %s571_s25 = smov (!%p138_p2), 111  }
   0xb   : > { %s667_s13 = smov (!%p161_p3, %s520_s13), 1  ;;  %v172_v19 = vlaneseq  ;;  %vm295_vm0 = vcmask 7168   ;;  %vm249_vm2 = vcmask 130048   ;;  %vm275_vm3 = vcmask 121856   ;;  %v406_v63 = vld [vmem:[%s664_s2] sm:$0xff] }
   0xc   : > { %s535_s14 = sshll.u32 %s667_s13, 3  ;;  %vm326_vm6 = vcmask 1039360   ;;  %vm229_vm8 = vcmask 138240   ;;  %vm348_vm9 = vcmask 924672   ;;  %vm364_vm10 = vcmask 916480   ;;  %s536_s30 = sshll.u32 %s667_s13, 4 }
   0xd   : > { %s165_s17 = scalar_lea.vmem %s662_s0, %s535_s14  ;;  %v173_v20 = vand.u32 127, %v172_v19  ;;  %vm386_vm11 = vcmask 908288   ;;  %vm416_vm12 = vcmask 1043456   ;;  %vm412_vm13 = vcmask 293888   ;;  %s170_s6 = scalar_lea.vmem %s665_s3, %s536_s30 }
   0xe   : > { %v171_v0 = vld [vmem:[%s165_s17] sm:$0xff] }
   0xf   : > { %222 = vst [vmem:[#allocation1] ss:$2 sm:$0xff] %v171_v0  ;;  %v179_v22 = vand.u32 15, %v173_v20  ;;  %v174_v28 = vadd.s32 128, %v173_v20 }
  0x11   : > { %v199_v23 = vadd.s32 4294967295, %v179_v22  ;;  %v186_v30 = vand.u32 15, %v174_v28  ;;  %v615_v33 = vadd.s32 1, %v179_v22 }
  0x13   : > { %vm201_vm1 = vcmp.ge.s32.totalorder %v199_v23, 0  ;;  %v617_v34 = vadd.s32 1, %v186_v30  ;;  %vm217_vm4 = vcmp.lt.s32.totalorder %v615_v33, 16  ;;  %v625_v41 = vadd.s32 4294967295, %v186_v30 }
  0x15   : > { %vm218_vm5 = vcmp.lt.s32.totalorder %v617_v34, 16  ;;  %vm202_vm7 = vcmp.ge.s32.totalorder %v625_v41, 0 }
  0x16   : > { %v223_v1 = vld.sshfl [vmem:[#allocation1] sm:$0xff pattern:$0x75316420]  ;;  %v224_v2 = vld.sshfl [vmem:[#allocation1 + $0x8] sm:$0xff pattern:$0x75316420] }
  0x17   : > { %242 = vst [vmem:[#allocation1] ss:$2 sm:$0xff] %v171_v0 }
  0x1e   : > { %v243_v3 = vld.sshfl [vmem:[#allocation1] sm:$0xff pattern:$0x75316420]  ;;  %v244_v4 = vld.sshfl [vmem:[#allocation1 + $0x8] sm:$0xff pattern:$0x75316420] }
  0x1f   : > { %268 = vst [vmem:[#allocation1] ss:$2 sm:$0xff] %v171_v0  ;;  %245 = vrot.lane.b32.xlu0 %v243_v3, %s564_s18 }
  0x26   : > { %v270_v5 = vld.sshfl [vmem:[#allocation1 + $0x8] sm:$0xff pattern:$0x75316420]  ;;  %v269_v6 = vld.sshfl [vmem:[#allocation1] sm:$0xff pattern:$0x75316420] }
  0x27   : > { %273 = vrot.lane.b32.xlu2 %v270_v5, %s565_s19  ;;  %271 = vrot.lane.b32.xlu1 %v269_v6, %s565_s19  ;;  %288 = vst [vmem:[#allocation1] ss:$2 sm:$0xff] %v171_v0 }
  0x2e   : > { %v289_v7 = vld.sshfl [vmem:[#allocation1] sm:$0xff pattern:$0x75316420]  ;;  %v290_v8 = vld.sshfl [vmem:[#allocation1 + $0x8] sm:$0xff pattern:$0x75316420] }
  0x2f   : > { %291 = vrot.lane.b32.xlu2 %v289_v7, %s566_s20  ;;  %293 = vrot.lane.b32.xlu0 %v290_v8, %s566_s20  ;;  %310 = vst [vmem:[#allocation1] ss:$2 sm:$0xff] %v171_v0 }
  0x36   : > { %v311_v9 = vld.sshfl [vmem:[#allocation1] sm:$0xff pattern:$0x75316420]  ;;  %v312_v10 = vld.sshfl [vmem:[#allocation1 + $0x8] sm:$0xff pattern:$0x75316420] }
  0x37   : > { %319 = vst [vmem:[#allocation1] ss:$2 sm:$0xff] %v171_v0 }
  0x38   : > { %317 = vst [vmem:[#allocation2 + $0x48] sm:$0xf] %v311_v9 }
  0x39   : > { %318 = vst [vmem:[#allocation2 + $0x28] sm:$0xf] %v312_v10 }
  0x3e   : > { %v320_v11 = vld.sshfl [vmem:[#allocation1] sm:$0xff pattern:$0x75316420]  ;;  %v321_v12 = vld.sshfl [vmem:[#allocation1 + $0x8] sm:$0xff pattern:$0x75316420] }
  0x3f   : > { %341 = vst [vmem:[#allocation1] ss:$2 sm:$0xff] %v171_v0  ;;  %322 = vrot.lane.b32.xlu2 %v320_v11, %s567_s21 }
  0x46   : > { %v343_v13 = vld.sshfl [vmem:[#allocation1 + $0x8] sm:$0xff pattern:$0x75316420]  ;;  %v342_v14 = vld.sshfl [vmem:[#allocation1] sm:$0xff pattern:$0x75316420] }
  0x47   : > { %346 = vrot.lane.b32.xlu1 %v343_v13, %s568_s22  ;;  %344 = vrot.lane.b32.xlu0 %v342_v14, %s568_s22  ;;  %357 = vst [vmem:[#allocation1] ss:$2 sm:$0xff] %v171_v0 }
  0x48   : > { %324 = vrot.lane.b32.xlu2 %v321_v12, %s567_s21 }
  0x4e   : > { %v358_v15 = vld.sshfl [vmem:[#allocation1] sm:$0xff pattern:$0x75316420]  ;;  %v359_v16 = vld.sshfl [vmem:[#allocation1 + $0x8] sm:$0xff pattern:$0x75316420] }
  0x4f   : > { %360 = vrot.lane.b32.xlu1 %v358_v15, %s569_s23  ;;  %379 = vst [vmem:[#allocation1] ss:$2 sm:$0xff] %v171_v0  ;;  %v572_v0 = vmov 0  }
  0x50   : > { %225 = vrot.lane.b32.xlu2 %v223_v1, %s570_s24  ;;  %554 = vset.pattern.permute.xlu1 %v572_v0 }
  0x51   : > { %555 = vset.pattern.permute.xlu0 %v572_v0 }
  0x56   : > { %v380_v17 = vld.sshfl [vmem:[#allocation1] sm:$0xff pattern:$0x75316420]  ;;  %v381_v18 = vld.sshfl [vmem:[#allocation1 + $0x8] sm:$0xff pattern:$0x75316420] }
  0x57   : > { %362 = vrot.lane.b32.xlu1 %v359_v16, %s569_s23  ;;  %382 = vrot.lane.b32.xlu0 %v380_v17, %s571_s25 }
  0x5f   : > { %247 = vrot.lane.b32.xlu1 %v244_v4, %s564_s18  ;;  %384 = vrot.lane.b32.xlu0 %v381_v18, %s571_s25 }
  0x67   : > { %227 = vrot.lane.b32.xlu0 %v224_v2, %s570_s24  ;;  %409 = vperm.xlu1 %554, %v406_v63  }
  0x81   : > { %v274_v21 = vpop.permute.xlu2 %273 }
  0x89   : > { %v292_v24 = vpop.permute.xlu2 %291 }
  0x8a   : > { %v299_v25 = vsel %vm295_vm0, 0.0, %v292_v24 }
  0x8b   : > { %v300_v26 = vsel %vm201_vm1, %v299_v25, 0.0  ;;  %v395_v25 = vld [vmem:[%s663_s1] sm:$0xff] }
  0x8c   : > { %v304_v27 = vrot.slane %v300_v26, 4 }
  0x8e   : > { %308 = vst [vmem:[#allocation2 + $0x18] sm:$0xf0] %v304_v27 }
  0x91   : > { %v611_v29 = vpop.permute.xlu0 %245 }
  0x92   : > { %v253_v31 = vsel %vm249_vm2, 0.0, %v611_v29 }
  0x93   : > { %v262_v32 = vrot.slane %v253_v31, 4 }
  0x95   : > { %266 = vst [vmem:[#allocation2 + $0x30] sm:$0xf0] %v262_v32 }
  0x99   : > { %v323_v35 = vpop.permute.xlu2 %322  ;;  %v272_v36 = vpop.permute.xlu1 %271 }
  0x9a   : > { %v276_v37 = vsel %vm275_vm3, %v272_v36, %v274_v21  ;;  %v279_v38 = vsel %vm275_vm3, 0.0, %v272_v36 }
  0x9b   : > { %v284_v39 = vsel %vm217_vm4, %v279_v38, 0.0  ;;  %v285_v40 = vsel %vm218_vm5, %v276_v37, 0.0 }
  0x9c   : > { %286 = vst [vmem:[#allocation2 + $0x18] sm:$0xf] %v284_v39 }
  0x9d   : > { %287 = vst [vmem:[#allocation2 + $0x10] sm:$0xf] %v285_v40 }
  0xa1   : > { %v294_v42 = vpop.permute.xlu0 %293 }
  0xa2   : > { %v325_v43 = vpop.permute.xlu2 %324  ;;  %v296_v44 = vsel %vm295_vm0, %v292_v24, %v294_v42 }
  0xa3   : > { %v327_v45 = vsel %vm326_vm6, %v323_v35, %v325_v43  ;;  %v330_v46 = vsel %vm326_vm6, %v325_v43, 0.0  ;;  %v301_v47 = vsel %vm202_vm7, %v296_v44, 0.0  ;;  %v398_v24 = vld [vmem:[#allocation2 + $0x18] sm:$0xff] }
  0xa4   : > { %v331_v48 = vsel %vm217_vm4, %v327_v45, 0.0  ;;  %v332_v49 = vsel %vm218_vm5, %v330_v46, 0.0  ;;  %v305_v50 = vrot.slane %v301_v47, 4 }
  0xa5   : > { %v335_v51 = vrot.slane %v331_v48, 4  ;;  %v336_v52 = vrot.slane %v332_v49, 4 }
  0xa6   : > { %309 = vst [vmem:[#allocation2 + $0x10] sm:$0xf0] %v305_v50 }
  0xa7   : > { %339 = vst [vmem:[#allocation2 + $0x48] sm:$0xf0] %v335_v51 }
  0xa8   : > { %340 = vst [vmem:[#allocation2 + $0x28] sm:$0xf0] %v336_v52 }
  0xaa   : > { %v226_v53 = vpop.permute.xlu2 %225 }
  0xab   : > { %v233_v54 = vsel %vm229_vm8, 0.0, %v226_v53 }
  0xac   : > { %v238_v55 = vsel %vm201_vm1, %v233_v54, 0.0 }
  0xad   : > { %240 = vst [vmem:[#allocation2 + $0x30] sm:$0xf] %v238_v55  ;;  %v399_v26 = vld [vmem:[#allocation2 + $0x10] sm:$0xff] }
  0xae   : > { %v400_v22 = vld [vmem:[#allocation2 + $0x48] sm:$0xff] }
  0xaf   : > { %v401_v23 = vld [vmem:[#allocation2 + $0x28] sm:$0xff] }
  0xb4   : > { %v396_v27 = vld [vmem:[#allocation2 + $0x30] sm:$0xff] }
  0xb9   : > { %v347_v56 = vpop.permute.xlu1 %346  ;;  %v345_v57 = vpop.permute.xlu0 %344 }
  0xba   : > { %v352_v58 = vsel %vm348_vm9, %v347_v56, 0.0  ;;  %v349_v59 = vsel %vm348_vm9, %v345_v57, %v347_v56 }
  0xbb   : > { %v354_v60 = vsel %vm202_vm7, %v352_v58, 0.0  ;;  %v353_v61 = vsel %vm201_vm1, %v349_v59, 0.0 }
  0xbc   : > { %356 = vst [vmem:[#allocation2 + $0x20] sm:$0xf] %v354_v60 }
  0xbd   : > { %355 = vst [vmem:[#allocation2 + $0x8] sm:$0xf] %v353_v61 }
  0xc1   : > { %v361_v62 = vpop.permute.xlu1 %360 }
  0xc9   : > { %v363_v1 = vpop.permute.xlu1 %362  ;;  %v383_v2 = vpop.permute.xlu0 %382 }
  0xca   : > { %v365_v3 = vsel %vm364_vm10, %v361_v62, %v363_v1  ;;  %v368_v4 = vsel %vm364_vm10, %v363_v1, 0.0 }
  0xcb   : > { %v373_v5 = vrot.slane %v365_v3, 4  ;;  %v374_v6 = vrot.slane %v368_v4, 4 }
  0xcd   : > { %377 = vst [vmem:[#allocation2 + $0x8] sm:$0xf0] %v373_v5 }
  0xce   : > { %378 = vst [vmem:[#allocation2 + $0x20] sm:$0xf0] %v374_v6 }
  0xd1   : > { %v248_v7 = vpop.permute.xlu1 %247  ;;  %v385_v8 = vpop.permute.xlu0 %384 }
  0xd2   : > { %v250_v9 = vsel %vm249_vm2, %v611_v29, %v248_v7  ;;  %v387_v10 = vsel %vm386_vm11, %v383_v2, %v385_v8  ;;  %v390_v11 = vsel %vm386_vm11, %v385_v8, 0.0 }
  0xd3   : > { %v263_v12 = vrot.slane %v250_v9, 4  ;;  %v391_v13 = vsel %vm217_vm4, %v387_v10, 0.0  ;;  %v392_v14 = vsel %vm218_vm5, %v390_v11, 0.0 }
  0xd4   : > { %393 = vst [vmem:[#allocation2 + $0x40] sm:$0xf] %v391_v13  ;;  %v402_v20 = vld [vmem:[#allocation2 + $0x8] sm:$0xff] }
  0xd5   : > { %267 = vst [vmem:[#allocation2] sm:$0xf0] %v263_v12  ;;  %v403_v21 = vld [vmem:[#allocation2 + $0x20] sm:$0xff] }
  0xd6   : > { %394 = vst [vmem:[#allocation2 + $0x38] sm:$0xf] %v392_v14 }
  0xd9   : > { %v228_v15 = vpop.permute.xlu0 %227  ;;  %v410_v29 = vpop.permute.xlu1 %409 }
  0xda   : > { %v230_v16 = vsel %vm229_vm8, %v226_v53, %v228_v15 }
  0xdb   : > { %v239_v17 = vsel %vm202_vm7, %v230_v16, 0.0  ;;  %v404_v18 = vld [vmem:[#allocation2 + $0x40] sm:$0xf] }
  0xdc   : > { %241 = vst [vmem:[#allocation2] sm:$0xf] %v239_v17  ;;  %529 = vmatpush.msk.msra.mxu0 %vm416_vm12, %v404_v18 }
  0xdd   : > { %v405_v19 = vld [vmem:[#allocation2 + $0x38] sm:$0xf] }
  0xde   : > { %531 = vmatpush.msk.msra.mxu1 %vm416_vm12, %v405_v19  ;;  %435 = vmatpush.msra.mxu0 %v402_v20 }
  0xe0   : > { %455 = vmatpush.msra.mxu1 %v403_v21  ;;  %436 = vmatpush.msra.mxu0 %v400_v22 }
  0xe2   : > { %456 = vmatpush.msra.mxu1 %v401_v23  ;;  %437 = vmatpush.msra.mxu0 %v398_v24 }
  0xe3   : > { %v397_v28 = vld [vmem:[#allocation2] sm:$0xff] }
  0xe4   : > { %457 = vmatpush.msra.mxu1 %v399_v26  ;;  %438 = vmatpush.msra.mxu0 %v396_v27 }
  0xe5   : > { %530 = vmatmul.msk.f32.vlgmr.msra.gmra.mxu0 %vm412_vm13, %v395_v25 }
  0xe6   : > { %458 = vmatpush.msra.mxu1 %v397_v28 }
  0xe7   : > { %532 = vmatmul.msk.f32.vlgmr.msra.gmra.mxu1 %vm412_vm13, %v395_v25 }
 0x162   : > { %v440_v30 = vpop.f32.mrf.mxu0 }
 0x163   : > { %v441_v31 = vadd.f32 %v440_v30, %v410_v29 }
 0x164   : > { %v460_v32 = vpop.f32.mrf.mxu1 }
 0x165   : > { %463 = vst [vmem:[%s170_s6] sm:$0xff] %v441_v31  ;;  %v461_v33 = vadd.f32 %v460_v32, %v410_v29 }
 0x167   : > { %464 = vst [vmem:[%s170_s6 + $0x8] sm:$0xff] %v461_v33 }
 0x168 PF: > { %s13_s12 = sadd.s32 1, %s562_s12  }
 0x169   : > { %p10_p4 = scmp.ge.s32.totalorder %s13_s12, 4  }
 0x16b   :  { %12 = sbr.rel (!%p10_p4) target bundleno = 1 (0x1), region = 62 }

</bundles_post_ra>
